<compile_context>
chip_gen: v7x
topology: tpu7x:2x2x1
jax: 0.10.0
libtpu: 0.0.40
codegen_flags: <defaults>
</compile_context>

<pallas_src>
import functools
import math

import jax
import jax.numpy as jnp
from jax.experimental import pallas as pl
from jax.experimental.pallas import tpu as pltpu

IN_DIM = 3
HIDDEN = (16, 16, 16)
LATENT_DIM = 64


def _silu(v):
    # x * sigmoid(x) == x * (0.5 * tanh(x/2) + 0.5): one EUP op per element.
    return v * (0.5 * jnp.tanh(0.5 * v) + 0.5)


def pde_encoder_kernel(x_ref, y_ref, z_ref,
                       w1_ref, b1_ref,
                       w2_ref, b2_ref,
                       w3_ref, b3_ref,
                       wot_ref, bo_ref,
                       out_ref, *, mxu_dtype):
    # Feature-major body: activations are (features, tb), batch on the lane axis.
    x = x_ref[...]                          # (1, tb)
    y = y_ref[...]
    z = z_ref[...]

    # ResidualBlock(3 -> 16): in_size != out_size -> NO skip.  K = 3 is far too
    # small for the MXU; 3 broadcast FMAs on the VPU instead (kept in f32).
    w1 = w1_ref[...]                        # (16, 3) f32
    h1 = _silu(w1[:, 0:1] * x + w1[:, 1:2] * y + w1[:, 2:3] * z
               + b1_ref[...])               # (16, tb) f32

    # ResidualBlock(16 -> 16) with skip; bf16 MXU operands, f32 accumulation.
    h2 = _silu(jnp.dot(w2_ref[...], h1.astype(mxu_dtype),
                       preferred_element_type=jnp.float32)
               + b2_ref[...]) + h1          # (16, tb) f32

    # ResidualBlock(16 -> 16) with skip.
    h3 = _silu(jnp.dot(w3_ref[...], h2.astype(mxu_dtype),
                       preferred_element_type=jnp.float32)
               + b3_ref[...]) + h2          # (16, tb) f32

    # Output Linear(16 -> 64), computed batch-major so the store is the final
    # (tb, 64) tile of the (N, 64) output -- no wrapper transpose needed.
    h3_t = h3.T.astype(mxu_dtype)           # (tb, 16), small in-kernel transpose
    out = jnp.dot(h3_t, wot_ref[...], preferred_element_type=jnp.float32)
    out_ref[...] = (out + bo_ref[...]).astype(out_ref.dtype)   # (tb, 64)


def init_params(key):
    """Deterministic init mimicking nn.Linear default: U(-1/sqrt(in), 1/sqrt(in)).
    Weights stored as (out, in); biases as (out, 1) (nn.Linear convention)."""
    sizes = [(IN_DIM, HIDDEN[0]),
             (HIDDEN[0], HIDDEN[1]),
             (HIDDEN[1], HIDDEN[2]),
             (HIDDEN[2], LATENT_DIM)]
    params = []
    for (fan_in, fan_out) in sizes:
        key, kw, kb = jax.random.split(key, 3)
        bound = 1.0 / math.sqrt(fan_in)
        w = jax.random.uniform(kw, (fan_out, fan_in), jnp.float32, -bound, bound)
        b = jax.random.uniform(kb, (fan_out, 1), jnp.float32, -bound, bound)
        params.append((w, b))
    return params


def _pick_tile(n, cap=8192):
    """Batch tile: as large as useful (amortizes per-step overhead) but never
    larger than the 128-rounded batch.  VMEM @ tb=8192: ~4 MiB double-buffered
    output + a few MiB of compiler temporaries -- safe on v5e/v6e/v7x."""
    n128 = ((n + 127) // 128) * 128
    return max(128, min(cap, n128))


def pde_encoder(x, y, z, params, *, tb=None, out_dtype=jnp.float32, mxu_bf16=True):
    """x, y, z: (N, 1).  Returns (N, LATENT_DIM) batch-major (module convention)."""
    n = x.shape[0]
    # (N, 1) -> (1, N) is a free row-major reinterpretation (no concat / HBM pass).
    xr = x.reshape(1, n).astype(jnp.float32)
    yr = y.reshape(1, n).astype(jnp.float32)
    zr = z.reshape(1, n).astype(jnp.float32)

    if tb is None:
        tb = _pick_tile(n)
    tb = max(128, (tb // 128) * 128)
    grid = (pl.cdiv(n, tb),)   # ragged last tile handled by Pallas edge clipping

    (w1, b1), (w2, b2), (w3, b3), (wo, bo) = params
    wo_t = wo.T                          # (16, 64) tiny one-time transpose
    bo_row = bo.reshape(1, LATENT_DIM)   # (1, 64)

    mxu_dtype = jnp.bfloat16 if mxu_bf16 else jnp.float32
    w2c = w2.astype(mxu_dtype)
    w3c = w3.astype(mxu_dtype)
    wo_tc = wo_t.astype(mxu_dtype)

    row_spec = pl.BlockSpec((1, tb), lambda i: (0, i))

    def const_spec(a):
        return pl.BlockSpec(a.shape, lambda i: (0,) * a.ndim)

    return pl.pallas_call(
        functools.partial(pde_encoder_kernel, mxu_dtype=mxu_dtype),
        out_shape=jax.ShapeDtypeStruct((n, LATENT_DIM), out_dtype),
        grid_spec=pltpu.PrefetchScalarGridSpec(
            num_scalar_prefetch=0,
            grid=grid,
            in_specs=[
                row_spec, row_spec, row_spec,
                const_spec(w1), const_spec(b1),
                const_spec(w2c), const_spec(b2),
                const_spec(w3c), const_spec(b3),
                const_spec(wo_tc), const_spec(bo_row),
            ],
            out_specs=pl.BlockSpec((tb, LATENT_DIM), lambda i: (i, 0)),
        ),
        compiler_params=pltpu.CompilerParams(
            dimension_semantics=("parallel",),
            vmem_limit_bytes=32 * 1024 * 1024),
    )(xr, yr, zr, w1, b1, w2c, b2, w3c, b3, wo_tc, bo_row)


def pde_encoder_ref(x, y, z, params):
    """Pure-JAX f32 reference mirroring the PyTorch forward (batch-major)."""
    inp = jnp.concatenate([x, y, z], axis=1).astype(jnp.float32)   # (N, 3)
    (w1, b1), (w2, b2), (w3, b3), (wo, bo) = params                 # (out,in),(out,1)
    h = jax.nn.silu(inp @ w1.T + b1.T)           # no skip (3 != 16)
    h = jax.nn.silu(h @ w2.T + b2.T) + h
    h = jax.nn.silu(h @ w3.T + b3.T) + h
    return h @ wo.T + bo.T


if __name__ == "__main__":
    key = jax.random.PRNGKey(0)
    kx, ky, kz, kp = jax.random.split(key, 4)

    N = 300  # not a multiple of 128 -> exercises the ragged-last-tile path
    x = jax.random.normal(kx, (N, 1), jnp.float32)
    y = jax.random.normal(ky, (N, 1), jnp.float32)
    z = jax.random.normal(kz, (N, 1), jnp.float32)

    params = init_params(kp)
    ref = pde_encoder_ref(x, y, z, params)

    # 1) f32-MXU path, forced small tile -> multi-step grid + ragged edge.
    out_f32 = jax.block_until_ready(
        pde_encoder(x, y, z, params, tb=128, mxu_bf16=False))
    assert out_f32.shape == (N, LATENT_DIM), out_f32.shape
    assert jnp.allclose(out_f32, ref, atol=1e-4, rtol=1e-4), "f32 path mismatch"

    # 2) Default fast path: auto tile, bf16 MXU operands (f32 accumulation).
    out_fast = jax.block_until_ready(pde_encoder(x, y, z, params))
    assert out_fast.shape == (N, LATENT_DIM), out_fast.shape
    assert jnp.allclose(out_fast, ref, atol=5e-2, rtol=5e-2), "bf16 path mismatch"

    print("KERNEL_OK")
</pallas_src>

<mosaic_0001>
module attributes {stable_mosaic.version = 11 : i64} {
  func.func @pde_encoder_kernel(%arg0: i32, %arg1: memref<1x128xf32, #tpu.memory_space<vmem>>, %arg2: memref<1x128xf32, #tpu.memory_space<vmem>>, %arg3: memref<1x128xf32, #tpu.memory_space<vmem>>, %arg4: memref<16x3xf32, #tpu.memory_space<vmem>>, %arg5: memref<16x1xf32, #tpu.memory_space<vmem>>, %arg6: memref<16x16xf32, #tpu.memory_space<vmem>>, %arg7: memref<16x1xf32, #tpu.memory_space<vmem>>, %arg8: memref<16x16xf32, #tpu.memory_space<vmem>>, %arg9: memref<16x1xf32, #tpu.memory_space<vmem>>, %arg10: memref<16x64xf32, #tpu.memory_space<vmem>>, %arg11: memref<1x64xf32, #tpu.memory_space<vmem>>, %arg12: memref<128x64xf32, #tpu.memory_space<vmem>>) attributes {dimension_semantics = [#tpu.dimension_semantics<parallel>], iteration_bounds = array<i64: 3>, scalar_prefetch = 0 : i64, scratch_operands = 0 : i64, tpu.core_type = #tpu.core_type<tc>, window_params = [{transform_indices = @transform_0, window_bounds = array<i64: 1, 128>}, {transform_indices = @transform_1, window_bounds = array<i64: 1, 128>}, {transform_indices = @transform_2, window_bounds = array<i64: 1, 128>}, {pipeline_mode = #tpu.pipeline_mode<synchronous>, transform_indices = @transform_3, window_bounds = array<i64: 16, 3>}, {pipeline_mode = #tpu.pipeline_mode<synchronous>, transform_indices = @transform_4, window_bounds = array<i64: 16, 1>}, {pipeline_mode = #tpu.pipeline_mode<synchronous>, transform_indices = @transform_5, window_bounds = array<i64: 16, 16>}, {pipeline_mode = #tpu.pipeline_mode<synchronous>, transform_indices = @transform_6, window_bounds = array<i64: 16, 1>}, {pipeline_mode = #tpu.pipeline_mode<synchronous>, transform_indices = @transform_7, window_bounds = array<i64: 16, 16>}, {pipeline_mode = #tpu.pipeline_mode<synchronous>, transform_indices = @transform_8, window_bounds = array<i64: 16, 1>}, {pipeline_mode = #tpu.pipeline_mode<synchronous>, transform_indices = @transform_9, window_bounds = array<i64: 16, 64>}, {pipeline_mode = #tpu.pipeline_mode<synchronous>, transform_indices = @transform_10, window_bounds = array<i64: 1, 64>}, {transform_indices = @transform_11, window_bounds = array<i64: 128, 64>}]} {
    %c0 = arith.constant 0 : index
    %c0_0 = arith.constant 0 : index
    %0 = vector.load %arg1[%c0, %c0_0] : memref<1x128xf32, #tpu.memory_space<vmem>>, vector<1x128xf32>
    %c0_1 = arith.constant 0 : index
    %c0_2 = arith.constant 0 : index
    %1 = vector.load %arg2[%c0_1, %c0_2] : memref<1x128xf32, #tpu.memory_space<vmem>>, vector<1x128xf32>
    %c0_3 = arith.constant 0 : index
    %c0_4 = arith.constant 0 : index
    %2 = vector.load %arg3[%c0_3, %c0_4] : memref<1x128xf32, #tpu.memory_space<vmem>>, vector<1x128xf32>
    %c0_5 = arith.constant 0 : index
    %c0_6 = arith.constant 0 : index
    %3 = vector.load %arg4[%c0_5, %c0_6] : memref<16x3xf32, #tpu.memory_space<vmem>>, vector<16x3xf32>
    %4 = vector.extract_strided_slice %3 {offsets = [0, 0], sizes = [16, 1], strides = [1, 1]} : vector<16x3xf32> to vector<16x1xf32>
    %5 = vector.broadcast %4 : vector<16x1xf32> to vector<16x128xf32>
    %6 = vector.broadcast %0 : vector<1x128xf32> to vector<16x128xf32>
    %7 = arith.mulf %5, %6 : vector<16x128xf32>
    %8 = vector.extract_strided_slice %3 {offsets = [0, 1], sizes = [16, 1], strides = [1, 1]} : vector<16x3xf32> to vector<16x1xf32>
    %9 = vector.broadcast %8 : vector<16x1xf32> to vector<16x128xf32>
    %10 = vector.broadcast %1 : vector<1x128xf32> to vector<16x128xf32>
    %11 = arith.mulf %9, %10 : vector<16x128xf32>
    %12 = arith.addf %7, %11 : vector<16x128xf32>
    %13 = vector.extract_strided_slice %3 {offsets = [0, 2], sizes = [16, 1], strides = [1, 1]} : vector<16x3xf32> to vector<16x1xf32>
    %14 = vector.broadcast %13 : vector<16x1xf32> to vector<16x128xf32>
    %15 = vector.broadcast %2 : vector<1x128xf32> to vector<16x128xf32>
    %16 = arith.mulf %14, %15 : vector<16x128xf32>
    %17 = arith.addf %12, %16 : vector<16x128xf32>
    %c0_7 = arith.constant 0 : index
    %c0_8 = arith.constant 0 : index
    %18 = vector.load %arg5[%c0_7, %c0_8] : memref<16x1xf32, #tpu.memory_space<vmem>>, vector<16x1xf32>
    %19 = vector.broadcast %18 : vector<16x1xf32> to vector<16x128xf32>
    %20 = arith.addf %17, %19 : vector<16x128xf32>
    %cst = arith.constant 5.000000e-01 : f32
    %21 = vector.broadcast %cst : f32 to vector<16x128xf32>
    %22 = arith.mulf %21, %20 : vector<16x128xf32>
    %23 = math.tanh %22 : vector<16x128xf32>
    %cst_9 = arith.constant 5.000000e-01 : f32
    %24 = vector.broadcast %cst_9 : f32 to vector<16x128xf32>
    %25 = arith.mulf %24, %23 : vector<16x128xf32>
    %cst_10 = arith.constant 5.000000e-01 : f32
    %26 = vector.broadcast %cst_10 : f32 to vector<16x128xf32>
    %27 = arith.addf %25, %26 : vector<16x128xf32>
    %28 = arith.mulf %20, %27 : vector<16x128xf32>
    %c0_11 = arith.constant 0 : index
    %c0_12 = arith.constant 0 : index
    %29 = vector.load %arg6[%c0_11, %c0_12] : memref<16x16xf32, #tpu.memory_space<vmem>>, vector<16x16xf32>
    %cst_13 = arith.constant dense<0.000000e+00> : vector<16x128xf32>
    %30 = tpu.matmul %29, %28, %cst_13 {dimension_numbers = #tpu.dot_dimension_numbers<[1], [0], [0], [1], [0, 0, 1, 1], [], []>} : vector<16x16xf32>, vector<16x128xf32>, vector<16x128xf32> -> vector<16x128xf32>
    %c0_14 = arith.constant 0 : index
    %c0_15 = arith.constant 0 : index
    %31 = vector.load %arg7[%c0_14, %c0_15] : memref<16x1xf32, #tpu.memory_space<vmem>>, vector<16x1xf32>
    %32 = vector.broadcast %31 : vector<16x1xf32> to vector<16x128xf32>
    %33 = arith.addf %30, %32 : vector<16x128xf32>
    %cst_16 = arith.constant 5.000000e-01 : f32
    %34 = vector.broadcast %cst_16 : f32 to vector<16x128xf32>
    %35 = arith.mulf %34, %33 : vector<16x128xf32>
    %36 = math.tanh %35 : vector<16x128xf32>
    %cst_17 = arith.constant 5.000000e-01 : f32
    %37 = vector.broadcast %cst_17 : f32 to vector<16x128xf32>
    %38 = arith.mulf %37, %36 : vector<16x128xf32>
    %cst_18 = arith.constant 5.000000e-01 : f32
    %39 = vector.broadcast %cst_18 : f32 to vector<16x128xf32>
    %40 = arith.addf %38, %39 : vector<16x128xf32>
    %41 = arith.mulf %33, %40 : vector<16x128xf32>
    %42 = arith.addf %41, %28 : vector<16x128xf32>
    %c0_19 = arith.constant 0 : index
    %c0_20 = arith.constant 0 : index
    %43 = vector.load %arg8[%c0_19, %c0_20] : memref<16x16xf32, #tpu.memory_space<vmem>>, vector<16x16xf32>
    %cst_21 = arith.constant dense<0.000000e+00> : vector<16x128xf32>
    %44 = tpu.matmul %43, %42, %cst_21 {dimension_numbers = #tpu.dot_dimension_numbers<[1], [0], [0], [1], [0, 0, 1, 1], [], []>} : vector<16x16xf32>, vector<16x128xf32>, vector<16x128xf32> -> vector<16x128xf32>
    %c0_22 = arith.constant 0 : index
    %c0_23 = arith.constant 0 : index
    %45 = vector.load %arg9[%c0_22, %c0_23] : memref<16x1xf32, #tpu.memory_space<vmem>>, vector<16x1xf32>
    %46 = vector.broadcast %45 : vector<16x1xf32> to vector<16x128xf32>
    %47 = arith.addf %44, %46 : vector<16x128xf32>
    %cst_24 = arith.constant 5.000000e-01 : f32
    %48 = vector.broadcast %cst_24 : f32 to vector<16x128xf32>
    %49 = arith.mulf %48, %47 : vector<16x128xf32>
    %50 = math.tanh %49 : vector<16x128xf32>
    %cst_25 = arith.constant 5.000000e-01 : f32
    %51 = vector.broadcast %cst_25 : f32 to vector<16x128xf32>
    %52 = arith.mulf %51, %50 : vector<16x128xf32>
    %cst_26 = arith.constant 5.000000e-01 : f32
    %53 = vector.broadcast %cst_26 : f32 to vector<16x128xf32>
    %54 = arith.addf %52, %53 : vector<16x128xf32>
    %55 = arith.mulf %47, %54 : vector<16x128xf32>
    %56 = arith.addf %55, %42 : vector<16x128xf32>
    %57 = tpu.transpose %56, [1, 0] : vector<16x128xf32> -> vector<128x16xf32>
    %c0_27 = arith.constant 0 : index
    %c0_28 = arith.constant 0 : index
    %58 = vector.load %arg10[%c0_27, %c0_28] : memref<16x64xf32, #tpu.memory_space<vmem>>, vector<16x64xf32>
    %cst_29 = arith.constant dense<0.000000e+00> : vector<128x64xf32>
    %59 = tpu.matmul %57, %58, %cst_29 {dimension_numbers = #tpu.dot_dimension_numbers<[1], [0], [0], [1], [0, 0, 1, 1], [], []>} : vector<128x16xf32>, vector<16x64xf32>, vector<128x64xf32> -> vector<128x64xf32>
    %c0_30 = arith.constant 0 : index
    %c0_31 = arith.constant 0 : index
    %60 = vector.load %arg11[%c0_30, %c0_31] : memref<1x64xf32, #tpu.memory_space<vmem>>, vector<1x64xf32>
    %61 = vector.broadcast %60 : vector<1x64xf32> to vector<128x64xf32>
    %62 = arith.addf %59, %61 : vector<128x64xf32>
    %c0_32 = arith.constant 0 : index
    %c0_33 = arith.constant 0 : index
    %63 = vector.load %arg12[%c0_32, %c0_33] : memref<128x64xf32, #tpu.memory_space<vmem>>, vector<128x64xf32>
    tpu.vector_store %arg12[%c0_32, %c0_33], %62 {strides = array<i32>} : memref<128x64xf32, #tpu.memory_space<vmem>>, vector<128x64xf32>,
    return
  }
  func.func @transform_0(%arg0: i32) -> (i32, i32) {
    %c0_i32 = arith.constant 0 : i32
    %c0_i32_0 = arith.constant 0 : i32
    return %c0_i32, %arg0 : i32, i32
  }
  func.func @transform_1(%arg0: i32) -> (i32, i32) {
    %c0_i32 = arith.constant 0 : i32
    %c0_i32_0 = arith.constant 0 : i32
    return %c0_i32, %arg0 : i32, i32
  }
  func.func @transform_2(%arg0: i32) -> (i32, i32) {
    %c0_i32 = arith.constant 0 : i32
    %c0_i32_0 = arith.constant 0 : i32
    return %c0_i32, %arg0 : i32, i32
  }
  func.func @transform_3(%arg0: i32) -> (i32, i32) {
    %c0_i32 = arith.constant 0 : i32
    %c0_i32_0 = arith.constant 0 : i32
    %c0_i32_1 = arith.constant 0 : i32
    return %c0_i32, %c0_i32_0 : i32, i32
  }
  func.func @transform_4(%arg0: i32) -> (i32, i32) {
    %c0_i32 = arith.constant 0 : i32
    %c0_i32_0 = arith.constant 0 : i32
    %c0_i32_1 = arith.constant 0 : i32
    return %c0_i32, %c0_i32_0 : i32, i32
  }
  func.func @transform_5(%arg0: i32) -> (i32, i32) {
    %c0_i32 = arith.constant 0 : i32
    %c0_i32_0 = arith.constant 0 : i32
    %c0_i32_1 = arith.constant 0 : i32
    return %c0_i32, %c0_i32_0 : i32, i32
  }
  func.func @transform_6(%arg0: i32) -> (i32, i32) {
    %c0_i32 = arith.constant 0 : i32
    %c0_i32_0 = arith.constant 0 : i32
    %c0_i32_1 = arith.constant 0 : i32
    return %c0_i32, %c0_i32_0 : i32, i32
  }
  func.func @transform_7(%arg0: i32) -> (i32, i32) {
    %c0_i32 = arith.constant 0 : i32
    %c0_i32_0 = arith.constant 0 : i32
    %c0_i32_1 = arith.constant 0 : i32
    return %c0_i32, %c0_i32_0 : i32, i32
  }
  func.func @transform_8(%arg0: i32) -> (i32, i32) {
    %c0_i32 = arith.constant 0 : i32
    %c0_i32_0 = arith.constant 0 : i32
    %c0_i32_1 = arith.constant 0 : i32
    return %c0_i32, %c0_i32_0 : i32, i32
  }
  func.func @transform_9(%arg0: i32) -> (i32, i32) {
    %c0_i32 = arith.constant 0 : i32
    %c0_i32_0 = arith.constant 0 : i32
    %c0_i32_1 = arith.constant 0 : i32
    return %c0_i32, %c0_i32_0 : i32, i32
  }
  func.func @transform_10(%arg0: i32) -> (i32, i32) {
    %c0_i32 = arith.constant 0 : i32
    %c0_i32_0 = arith.constant 0 : i32
    %c0_i32_1 = arith.constant 0 : i32
    return %c0_i32, %c0_i32_0 : i32, i32
  }
  func.func @transform_11(%arg0: i32) -> (i32, i32) {
    %c0_i32 = arith.constant 0 : i32
    %c0_i32_0 = arith.constant 0 : i32
    return %arg0, %c0_i32 : i32, i32
  }
}

</mosaic_0001>

<bundles_post_ra>
// kernel: tpu_custom_call.1
= control target key start
LH: loop header
LB: loop body
LE: loop exit
PB: predicated region body
PF: predicated region fallthrough
CT: control target
= control target key end

     0   :  { %s1639_s17 = smov 0   ;;  %s1641_s18 = smov 0   ;;  %s1879_s0 = inlined_call_operand.vmem [shape: f32[1,300], index: 0, kind: input, shape index: {}]   ;;  %s1880_s1 = inlined_call_operand.vmem [shape: f32[1,300], index: 1, kind: input, shape index: {}]   ;;  %s1881_s2 = inlined_call_operand.vmem [shape: f32[1,300], index: 2, kind: input, shape index: {}]   ;;  %s1882_s3 = inlined_call_operand.vmem [shape: f32[16,3], index: 3, kind: input, shape index: {}]   ;;  %s1883_s4 = inlined_call_operand.vmem [shape: f32[16,1], index: 4, kind: input, shape index: {}]   ;;  %s1884_s5 = inlined_call_operand.vmem [shape: f32[16,16], index: 5, kind: input, shape index: {}]   ;;  %s1885_s6 = inlined_call_operand.vmem [shape: f32[16,1], index: 6, kind: input, shape index: {}]   ;;  %s1886_s7 = inlined_call_operand.vmem [shape: f32[16,16], index: 7, kind: input, shape index: {}]   ;;  %s1887_s8 = inlined_call_operand.vmem [shape: f32[16,1], index: 8, kind: input, shape index: {}]   ;;  %s1888_s9 = inlined_call_operand.vmem [shape: f32[16,64], index: 9, kind: input, shape index: {}]   ;;  %s1889_s10 = inlined_call_operand.vmem [shape: f32[1,64], index: 10, kind: input, shape index: {}]   ;;  %s1890_s11 = inlined_call_operand.vmem [shape: f32[300,64], index: 11, kind: output, shape index: {}]  }
   0x1   :  { %s1643_s19 = smov 0  }
   0x2 LB: > { %s1652_s20 = sadd.s32 4294967295, %s1542_s19   ;;  %s1654_s21 = sadd.s32 1, %s1542_s19   ;;  %s1542_s19 = sphi %s1643_s19, %s1897_s19   ;;  %s1538_s18 = sphi %s1641_s18, %s1896_s18   ;;  %s1534_s17 = sphi %s1639_s17, %s1895_s17  }
   0x3   : > { %s271_s22 = ssub.s32 %s1542_s19, %s1654_s21  ;;  %s274_s23 = sadd.s32 1, %s1538_s18 }
   0x4   : > { %p272_p0 = scmp.eq.s32.totalorder %s271_s22, 0  ;;  %p284_p1 = scmp.ne.s32.totalorder %s1538_s18, %s1534_s17 }
   0x5   : > { %p285_p2 = scmp.eq.s32.totalorder %s1652_s20, 2  ;;  %p1250_p3 = scmp.ge.s32.totalorder %s1542_s19, 1 }
   0x6   : > { %s1662_s24 = scalar_select %p272_p0, %s1538_s18, %s274_s23  }
   0x7   : > { %p1664_p4 = por %p285_p2, %p284_p1  ;;  %p351_p5 = scmp.lt.s32.totalorder %s1542_s19, 4 }
   0x9   : > { %p352_p6 = pnand %p1250_p3, %p351_p5 }
   0xa   : > { %v411_v0 = vld [vmem:[%s1882_s3] sm:$0xff] (!%p352_p6)  ;;  %v1576_v1 = vmov (!%p352_p6), 1   ;;  %v1577_v2 = vmov (!%p352_p6), 0   ;;  %v412_v3 = vld [vmem:[%s1882_s3 + $0x8] sm:$0xff] (!%p352_p6)  ;;  %v1578_v4 = vmov (!%p352_p6), 2   ;;  %vm505_vm0 = vcmask (!%p352_p6), 130048  }
   0xb   : > { %355 = sbr.rel (%p352_p6) target bundleno = 1114 (0x45a), region = 64  ;;  %1471 = vset.pattern.permute.xlu1 (!%p352_p6), %v1576_v1  ;;  %1470 = vset.pattern.permute.xlu0 (!%p352_p6), %v1577_v2  ;;  %v467_v5 = vld [vmem:[%s1883_s4] sm:$0xff] (!%p352_p6)  ;;  %v468_v6 = vld [vmem:[%s1883_s4 + $0x8] sm:$0xff] (!%p352_p6)  ;;  %p394_p7 = scmp.lt.s32.totalorder (!%p352_p6), %s1652_s20, 2  ;;  %vm940_vm1 = vcmask (!%p352_p6), 523264  }
   0xc   : > { %432 = vperm.xlu1 (!%p352_p6), %1471, %v411_v0   ;;  %415 = vperm.xlu0 (!%p352_p6), %1470, %v411_v0   ;;  %v493_v7 = vld [vmem:[%s1885_s6] sm:$0xff] (!%p352_p6)  ;;  %v494_v9 = vld [vmem:[%s1885_s6 + $0x8] sm:$0xff] (!%p352_p6)  ;;  %s391_s23 = sand.u32 (!%p352_p6), 1, %s1534_s17  }
   0xd   : > { %v601_v8 = vld [vmem:[%s1887_s8] sm:$0xff] (!%p352_p6)  ;;  %v602_v10 = vld [vmem:[%s1887_s8 + $0x8] sm:$0xff] (!%p352_p6)  ;;  %s1251_s26 = sshll.u32 (!%p352_p6), %s391_s23, 7 }
   0xe   : > { %v491_v11 = vld [vmem:[%s1884_s5] sm:$0xff] (!%p352_p6)  ;;  %v492_v46 = vld [vmem:[%s1884_s5 + $0x8] sm:$0xff] (!%p352_p6)  ;;  %s1745_s29 = scalar_lea.vmem (!%p352_p6), [#allocation2], %s1251_s26  }
   0xf   : > { %1326 = vmatprep.mubr.msk.f32.mxu0 (!%p352_p6), %vm505_vm0, %v491_v11  ;;  %v599_v47 = vld [vmem:[%s1886_s7] sm:$0xff] (!%p352_p6) }
  0x10   : > { %436 = vperm.xlu1 (!%p352_p6), %1471, %v412_v3   ;;  %420 = vperm.xlu0 (!%p352_p6), %1470, %v412_v3  }
  0x11   : > { %1333 = vmatprep.mubr.msk.f32.mxu1 (!%p352_p6), %vm505_vm0, %v599_v47 }
  0x12   : > { %s395_s12 = scalar_select %p394_p7, %s1652_s20, 2 }
  0x13   : > { %s1277_s17 = sshll.u32 (%p1664_p4), %s1652_s20, 4  ;;  %s1293_s30 = sshll.u32 (%p1664_p4), %s1652_s20, 7 }
  0x14   : > { %1473 = vset.pattern.permute.xlu1 %v1578_v4  ;;  %1472 = vset.pattern.permute.xlu0 %v1578_v4  ;;  %s399_s15 = scalar_lea.vmem %s1880_s1, %s395_s12  ;;  %s396_s22 = scalar_lea.vmem %s1879_s0, %s395_s12 }
  0x15   : > { %454 = vperm.xlu1 %1473, %v412_v3   ;;  %450 = vperm.xlu0 %1472, %v411_v0   ;;  %v1253_v14 = vld [vmem:[%s399_s15] ss:$0 sm:$0xff]  ;;  %s402_s27 = scalar_lea.vmem %s1881_s2, %s395_s12  ;;  %v600_v3 = vld [vmem:[%s1886_s7 + $0x8] sm:$0xff]  ;;  %s965_s12 = ssub.s32 (%p1664_p4), 38, %s1277_s17 }
  0x16   : > { %v1252_v15 = vld [vmem:[%s396_s22] ss:$0 sm:$0xff]  ;;  %s1786_s15 = scalar_lea.vmem (%p1664_p4), %s1890_s11, %s1293_s30   ;;  %p966_p8 = scmp.lt.s32.totalorder (%p1664_p4), %s965_s12, 16 }
  0x17   : > { %v1254_v22 = vld [vmem:[%s402_s27] ss:$0 sm:$0xff] }
  0x19   : > { %1474 = vset.pattern.permute.xlu1 %v1577_v2  ;;  %1475 = vset.pattern.permute.xlu0 %v1577_v2 }
  0x1a   : > { %471 = vperm.xlu1 %1474, %v467_v5   ;;  %476 = vperm.xlu0 %1475, %v468_v6  }
  0x1e   : > { %497 = vperm.xlu1 %1474, %v493_v7   ;;  %605 = vperm.xlu0 %1475, %v601_v8  }
  0x22   : > { %502 = vperm.xlu1 %1474, %v494_v9  }
  0x26   : > { %610 = vperm.xlu1 %1474, %v602_v10  }
  0x8b   : > { %v433_v12 = vpop.permute.xlu1 %432  ;;  %v416_v13 = vpop.permute.xlu0 %415 }
  0x8c   : > { %v445_v18 = vmul.f32 %v1253_v14, %v433_v12  ;;  %v429_v19 = vmul.f32 %v1252_v15, %v416_v13 }
  0x8e   : > { %v447_v25 = vadd.f32 %v445_v18, %v429_v19 }
  0x8f   : > { %v437_v16 = vpop.permute.xlu1 %436  ;;  %v421_v17 = vpop.permute.xlu0 %420 }
  0x90   : > { %v446_v20 = vmul.f32 %v1253_v14, %v437_v16  ;;  %v430_v21 = vmul.f32 %v1252_v15, %v421_v17 }
  0x92   : > { %v448_v26 = vadd.f32 %v446_v20, %v430_v21  ;;  %v738_v21 = vld [vmem:[%s1888_s9] sm:$0xff] }
  0x94   : > { %v455_v23 = vpop.permute.xlu1 %454  ;;  %v451_v24 = vpop.permute.xlu0 %450 }
  0x95   : > { %v464_v27 = vmul.f32 %v1254_v22, %v455_v23  ;;  %v463_v28 = vmul.f32 %v1254_v22, %v451_v24  ;;  %v739_v22 = vld [vmem:[%s1888_s9 + $0x8] sm:$0xff] }
  0x96   : > { %v1372_v23 = vpack.c.bf16 %v739_v22, %v738_v21 }
  0x97   : > { %v465_v29 = vadd.f32 %v463_v28, %v447_v25  ;;  %v466_v30 = vadd.f32 %v464_v27, %v448_v26 }
  0x99   : > { %v472_v31 = vpop.permute.xlu1 %471  ;;  %v477_v32 = vpop.permute.xlu0 %476 }
  0x9a   : > { %v479_v33 = vadd.f32 %v472_v31, %v465_v29  ;;  %v480_v34 = vadd.f32 %v477_v32, %v466_v30 }
  0x9c   : > { %v481_v35 = vmul.f32 0.5, %v479_v33  ;;  %v482_v36 = vmul.f32 0.5, %v480_v34 }
  0x9d   : > { %v498_v48 = vpop.permute.xlu1 %497  ;;  %v606_v6 = vpop.permute.xlu0 %605 }
  0x9e   : > { %1476 = vtanh.f32 %v481_v35 }
  0x9f   : > { %1478 = vtanh.f32 %v482_v36 }
  0xa1   : > { %v503_v49 = vpop.permute.xlu1 %502 }
  0xa5   : > { %v611_v4 = vpop.permute.xlu1 %610 }
  0xa8   : > { %v1477_v37 = vpop.eup %1476 }
  0xa9   : > { %v1479_v38 = vpop.eup %1478  ;;  %v485_v39 = vmul.f32 0.5, %v1477_v37 }
  0xaa   : > { %v486_v40 = vmul.f32 0.5, %v1479_v38 }
  0xab   : > { %v487_v41 = vadd.f32 0.5, %v485_v39 }
  0xac   : > { %v488_v42 = vadd.f32 0.5, %v486_v40 }
  0xad   : > { %v489_v43 = vmul.f32 %v487_v41, %v479_v33  ;;  %v1259_v41 = vld [vmem:[%s1889_s10] ss:$0 sm:$0xff] }
  0xae   : > { %v490_v44 = vmul.f32 %v488_v42, %v480_v34 }
  0xb0   : > { %v1364_v45 = vpack.c.bf16 %v490_v44, %v489_v43 }
  0xb2   : > { %1365 = vmatprep.subr.bf16.mxu0 %v1364_v45 }
  0xb3   : > { %1367 = vmatpush3.bf16.msra.mxu0 %v1364_v45 }
  0xb4   : > { %1373 = vmatprep.subr.bf16.mxu0 %v1372_v23 }
  0xb6   : > { %1327 = vmatmul.mubr.msk.f32.vlgmr.msra.gmra.mrb[0].mxu0 %vm505_vm0, %v492_v46 }
  0xb7   : > { %1375 = vmatpush3.bf16.msra.mxu0 %v1372_v23 }
 0x189   : > { %v1328_v50 = vpop.f32.mrb[0].mxu0 }
 0x18a   : > { %v584_v51 = vadd.f32 %v1328_v50, %v503_v49  ;;  %v578_v52 = vpop.f32.mrb[1].mxu0 }
 0x18b   : > { %v579_v53 = vadd.f32 %v578_v52, %v498_v48 }
 0x18c   : > { %v588_v54 = vmul.f32 0.5, %v584_v51 }
 0x18d   : > { %v587_v55 = vmul.f32 0.5, %v579_v53 }
 0x18e   : > { %1480 = vtanh.f32 %v588_v54 }
 0x18f   : > { %1482 = vtanh.f32 %v587_v55 }
 0x198   : > { %v1481_v56 = vpop.eup %1480 }
 0x199   : > { %v1483_v57 = vpop.eup %1482  ;;  %v592_v58 = vmul.f32 0.5, %v1481_v56 }
 0x19a   : > { %v591_v59 = vmul.f32 0.5, %v1483_v57 }
 0x19b   : > { %v594_v60 = vadd.f32 0.5, %v592_v58 }
 0x19c   : > { %v593_v61 = vadd.f32 0.5, %v591_v59 }
 0x19d   : > { %v596_v62 = vmul.f32 %v594_v60, %v584_v51 }
 0x19e   : > { %v595_v63 = vmul.f32 %v593_v61, %v579_v53 }
 0x19f   : > { %v598_v0 = vadd.f32 %v596_v62, %v490_v44 }
 0x1a0   : > { %v597_v1 = vadd.f32 %v595_v63, %v489_v43 }
 0x1a2   : > { %v1368_v2 = vpack.c.bf16 %v598_v0, %v597_v1 }
 0x1a4   : > { %1369 = vmatprep.subr.bf16.mxu1 %v1368_v2 }
 0x1a5   : > { %1371 = vmatpush3.bf16.msra.mxu1 %v1368_v2 }
 0x1a6   : > { %1376 = vmatprep.subr.bf16.mxu1 %v1372_v23 }
 0x1a8   : > { %1334 = vmatmul.mubr.msk.f32.vlgmr.msra.gmra.mrb[0].mxu1 %vm505_vm0, %v600_v3 }
 0x1a9   : > { %1377 = vmatpush3.bf16.msra.mxu1 %v1372_v23 }
 0x27b   : > { %v1335_v5 = vpop.f32.mrb[0].mxu1 }
 0x27c   : > { %v691_v7 = vadd.f32 %v1335_v5, %v611_v4  ;;  %v685_v8 = vpop.f32.mrb[1].mxu1 }
 0x27d   : > { %v686_v9 = vadd.f32 %v685_v8, %v606_v6 }
 0x27e   : > { %v695_v10 = vmul.f32 0.5, %v691_v7 }
 0x27f   : > { %v694_v11 = vmul.f32 0.5, %v686_v9 }
 0x280   : > { %1484 = vtanh.f32 %v695_v10 }
 0x281   : > { %1486 = vtanh.f32 %v694_v11 }
 0x28a   : > { %v1485_v12 = vpop.eup %1484 }
 0x28b   : > { %v1487_v13 = vpop.eup %1486  ;;  %v699_v14 = vmul.f32 0.5, %v1485_v12 }
 0x28c   : > { %v698_v15 = vmul.f32 0.5, %v1487_v13 }
 0x28d   : > { %v701_v16 = vadd.f32 0.5, %v699_v14 }
 0x28e   : > { %v700_v17 = vadd.f32 0.5, %v698_v15 }
 0x28f   : > { %v703_v19 = vmul.f32 %v701_v16, %v691_v7 }
 0x290   : > { %v702_v18 = vmul.f32 %v700_v17, %v686_v9 }
 0x291   : > { %v705_v24 = vadd.f32 %v703_v19, %v598_v0 }
 0x292   : > { %v704_v20 = vadd.f32 %v702_v18, %v597_v1 }
 0x294   : > { %706 = vxpose.xlu0.b32.start [1/2] (short) %v704_v20, 128 }
 0x298   : > { %707 = vxpose.xlu0.b32.end [2/2] (short) %v705_v24, 128 }
 0x314   : > { %v722_v25 = vpop.trf.xlu0 }
 0x315   : > { %1340 = vmatprep.mubr.msk.f32.mxu0 %vm505_vm0, %v722_v25 }
 0x318   : > { %v723_v26 = vpop.trf.xlu0 }
 0x319   : > { %1341 = vmatmul.mubr.msk.f32.vlgmr.msra.gmra.mrb[2].mxu0 %vm505_vm0, %v723_v26 }
 0x31c   : > { %v724_v27 = vpop.trf.xlu0 }
 0x31d   : > { %1343 = vmatprep.mubr.msk.f32.mxu0 %vm505_vm0, %v724_v27 }
 0x320   : > { %v725_v28 = vpop.trf.xlu0 }
 0x321   : > { %1344 = vmatmul.mubr.msk.f32.gmra.mrb[4].mxu0 %vm505_vm0, %v725_v28 }
 0x324   : > { %v726_v29 = vpop.trf.xlu0 }
 0x325   : > { %1346 = vmatprep.mubr.msk.f32.mxu0 %vm505_vm0, %v726_v29 }
 0x328   : > { %v727_v30 = vpop.trf.xlu0 }
 0x329   : > { %1347 = vmatmul.mubr.msk.f32.gmra.mrb[6].mxu0 %vm505_vm0, %v727_v30 }
 0x32c   : > { %v728_v31 = vpop.trf.xlu0 }
 0x32d   : > { %1349 = vmatprep.mubr.msk.f32.mxu0 %vm505_vm0, %v728_v31 }
 0x330   : > { %v729_v32 = vpop.trf.xlu0 }
 0x331   : > { %1350 = vmatmul.mubr.msk.f32.gmra.mrb[8].mxu0 %vm505_vm0, %v729_v32 }
 0x334   : > { %v730_v33 = vpop.trf.xlu0 }
 0x335   : > { %1352 = vmatprep.mubr.msk.f32.mxu1 %vm505_vm0, %v730_v33 }
 0x338   : > { %v731_v34 = vpop.trf.xlu0 }
 0x339   : > { %1353 = vmatmul.mubr.msk.f32.vlgmr.msra.gmra.mrb[2].mxu1 %vm505_vm0, %v731_v34 }
 0x33c   : > { %v732_v35 = vpop.trf.xlu0 }
 0x33d   : > { %1355 = vmatprep.mubr.msk.f32.mxu1 %vm505_vm0, %v732_v35 }
 0x340   : > { %v733_v36 = vpop.trf.xlu0 }
 0x341   : > { %1356 = vmatmul.mubr.msk.f32.gmra.mrb[4].mxu1 %vm505_vm0, %v733_v36 }
 0x344   : > { %v734_v37 = vpop.trf.xlu0 }
 0x345   : > { %1358 = vmatprep.mubr.msk.f32.mxu1 %vm505_vm0, %v734_v37 }
 0x348   : > { %v735_v38 = vpop.trf.xlu0 }
 0x349   : > { %1359 = vmatmul.mubr.msk.f32.gmra.mrb[6].mxu1 %vm505_vm0, %v735_v38 }
 0x34c   : > { %v736_v39 = vpop.trf.xlu0 }
 0x34d   : > { %1361 = vmatprep.mubr.msk.f32.mxu1 %vm505_vm0, %v736_v39 }
 0x350   : > { %v737_v40 = vpop.trf.xlu0 }
 0x351   : > { %1362 = vmatmul.mubr.msk.f32.gmra.mrb[8].mxu1 %vm505_vm0, %v737_v40 }
 0x3ec   : > { %v1342_v42 = vpop.f32.mrb[2].mxu0 }
 0x3ed   : > { %v867_v43 = vadd.f32 %v1342_v42, %v1259_v41  ;;  %v861_v44 = vpop.f32.mrb[3].mxu0 }
 0x3ee   : > { %v862_v45 = vadd.f32 %v1259_v41, %v861_v44 }
 0x3ef   : > { %942 = vst.msk [vmem:[%s1745_s29 + $0x8] sm:$0xff] %vm940_vm1, %v867_v43 }
 0x3f0   : > { %941 = vst.msk [vmem:[%s1745_s29] sm:$0xff] %vm940_vm1, %v862_v45 }
 0x3f4   : > { %v1345_v46 = vpop.f32.mrb[4].mxu0 }
 0x3f5   : > { %v877_v47 = vadd.f32 %v1345_v46, %v1259_v41  ;;  %v871_v48 = vpop.f32.mrb[5].mxu0 }
 0x3f6   : > { %v872_v49 = vadd.f32 %v1259_v41, %v871_v48 }
 0x3f7   : > { %944 = vst.msk [vmem:[%s1745_s29 + $0x18] sm:$0xff] %vm940_vm1, %v877_v47 }
 0x3f8   : > { %943 = vst.msk [vmem:[%s1745_s29 + $0x10] sm:$0xff] %vm940_vm1, %v872_v49 }
 0x3fc   : > { %v1348_v50 = vpop.f32.mrb[6].mxu0 }
 0x3fd   : > { %v887_v51 = vadd.f32 %v1348_v50, %v1259_v41  ;;  %v881_v52 = vpop.f32.mrb[7].mxu0 }
 0x3fe   : > { %v882_v53 = vadd.f32 %v1259_v41, %v881_v52 }
 0x3ff   : > { %946 = vst.msk [vmem:[%s1745_s29 + $0x28] sm:$0xff] %vm940_vm1, %v887_v51 }
 0x400   : > { %945 = vst.msk [vmem:[%s1745_s29 + $0x20] sm:$0xff] %vm940_vm1, %v882_v53 }
 0x404   : > { %v1351_v54 = vpop.f32.mrb[8].mxu0 }
 0x405   : > { %v897_v55 = vadd.f32 %v1351_v54, %v1259_v41  ;;  %v891_v56 = vpop.f32.mrb[9].mxu0 }
 0x406   : > { %v892_v57 = vadd.f32 %v1259_v41, %v891_v56 }
 0x407   : > { %948 = vst.msk [vmem:[%s1745_s29 + $0x38] sm:$0xff] %vm940_vm1, %v897_v55 }
 0x408   : > { %947 = vst.msk [vmem:[%s1745_s29 + $0x30] sm:$0xff] %vm940_vm1, %v892_v57 }
 0x40c   : > { %v1354_v58 = vpop.f32.mrb[2].mxu1 }
 0x40d   : > { %v907_v59 = vadd.f32 %v1354_v58, %v1259_v41  ;;  %v901_v60 = vpop.f32.mrb[3].mxu1 }
 0x40e   : > { %v902_v61 = vadd.f32 %v1259_v41, %v901_v60 }
 0x40f   : > { %950 = vst.msk [vmem:[%s1745_s29 + $0x48] sm:$0xff] %vm940_vm1, %v907_v59 }
 0x410   : > { %949 = vst.msk [vmem:[%s1745_s29 + $0x40] sm:$0xff] %vm940_vm1, %v902_v61 }
 0x414   : > { %v1357_v62 = vpop.f32.mrb[4].mxu1 }
 0x415   : > { %v917_v63 = vadd.f32 %v1357_v62, %v1259_v41  ;;  %v911_v0 = vpop.f32.mrb[5].mxu1 }
 0x416   : > { %v912_v1 = vadd.f32 %v1259_v41, %v911_v0 }
 0x417   : > { %952 = vst.msk [vmem:[%s1745_s29 + $0x58] sm:$0xff] %vm940_vm1, %v917_v63 }
 0x418   : > { %951 = vst.msk [vmem:[%s1745_s29 + $0x50] sm:$0xff] %vm940_vm1, %v912_v1 }
 0x41c   : > { %v1360_v2 = vpop.f32.mrb[6].mxu1 }
 0x41d   : > { %v927_v3 = vadd.f32 %v1360_v2, %v1259_v41  ;;  %v921_v4 = vpop.f32.mrb[7].mxu1 }
 0x41e   : > { %v922_v5 = vadd.f32 %v1259_v41, %v921_v4 }
 0x41f   : > { %954 = vst.msk [vmem:[%s1745_s29 + $0x68] sm:$0xff] %vm940_vm1, %v927_v3 }
 0x420   : > { %953 = vst.msk [vmem:[%s1745_s29 + $0x60] sm:$0xff] %vm940_vm1, %v922_v5 }
 0x422   : > { %963 = sbr.rel (!%p1664_p4) target bundleno = 1114 (0x45a), region = 68 }
 0x424   : > { %v1363_v6 = vpop.f32.mrb[8].mxu1 }
 0x425   : > { %v937_v7 = vadd.f32 %v1363_v6, %v1259_v41  ;;  %v931_v8 = vpop.f32.mrb[9].mxu1 }
 0x426   : > { %v932_v9 = vadd.f32 %v1259_v41, %v931_v8 }
 0x427   : > { %956 = vst.msk [vmem:[%s1745_s29 + $0x78] sm:$0xff] %vm940_vm1, %v937_v7 }
 0x428   : > { %955 = vst.msk [vmem:[%s1745_s29 + $0x70] sm:$0xff] %vm940_vm1, %v932_v9 }
 0x429   : > { %s1899_s12 = smov (!%p966_p8, %s965_s12), 16 }
 0x42a   : > { %s1278_s16 = sshll.u32 %s1899_s12, 7 }
 0x42b   : > { %p1281_p9 = scmp.eq.s32.totalorder %s1278_s16, 0 }
 0x42c   : > { %s1792_s25 = sshrl.u32 (!%p1281_p9), %s1899_s12, 4 }
 0x42d   : > { %974 = sbr.rel (%p1281_p9) target bundleno = 1114 (0x45a), region = 72  ;;  %p1282_p10 = scmp.le.s32.totalorder (!%p1281_p9), %s1792_s25, 0 }
 0x434   : > { %1191 = sbr.rel (%p1282_p10) target bundleno = 1093 (0x445), region = 154  ;;  %s1892_s20 = smov (!%p1282_p10), %s1786_s15 }
 0x435   : > { %s1893_s19 = smov (!%p1282_p10), %s1745_s29  ;;  %s1801_s22 = smov (!%p1282_p10), 0  }
 0x436   : > { %s1803_s23 = smov (!%p1282_p10), 0  }
 0x43b LB: >> { %v1066_v10 = vld [vmem:[%s1550_s19] sm:$0xff]  ;;  %v1068_v11 = vld [vmem:[%s1550_s19 + $0x8] sm:$0xff]  ;;  %v1070_v12 = vld [vmem:[%s1550_s19 + $0x10] sm:$0xff]  ;;  %s1098_s26 = sadd.s32 1, %s1554_s22  ;;  %s1060_s23 = sadd.s32 1, %s1558_s23   ;;  %s1558_s23 = sphi %s1803_s23, %s1060_s23   ;;  %s1554_s22 = sphi %s1801_s22, %s1894_s22   ;;  %s1550_s19 = sphi %s1893_s19, %s1103_s19   ;;  %s1546_s20 = sphi %s1892_s20, %s1104_s20  }
 0x43c   : >> { %1067 = vst [vmem:[%s1546_s20] sm:$0xff] %v1066_v10  ;;  %1069 = vst [vmem:[%s1546_s20 + $0x8] sm:$0xff] %v1068_v11  ;;  %v1072_v13 = vld [vmem:[%s1550_s19 + $0x18] sm:$0xff]  ;;  %v1074_v14 = vld [vmem:[%s1550_s19 + $0x20] sm:$0xff]  ;;  %p1099_p11 = scmp.ge.s32.totalorder %s1098_s26, %s1792_s25  ;;  %p1059_p12 = scmp.ge.s32.totalorder %s1060_s23, %s1792_s25 }
 0x43d   : >> { %1071 = vst [vmem:[%s1546_s20 + $0x10] sm:$0xff] %v1070_v12  ;;  %v1076_v15 = vld [vmem:[%s1550_s19 + $0x28] sm:$0xff]  ;;  %1073 = vst [vmem:[%s1546_s20 + $0x18] sm:$0xff] %v1072_v13  ;;  %v1078_v16 = vld [vmem:[%s1550_s19 + $0x30] sm:$0xff] }
 0x43e   : >> { %1075 = vst [vmem:[%s1546_s20 + $0x20] sm:$0xff] %v1074_v14  ;;  %1077 = vst [vmem:[%s1546_s20 + $0x28] sm:$0xff] %v1076_v15  ;;  %v1080_v17 = vld [vmem:[%s1550_s19 + $0x38] sm:$0xff]  ;;  %v1082_v18 = vld [vmem:[%s1550_s19 + $0x40] sm:$0xff]  ;;  %s1901_s26 = smov (%p1099_p11, %s1098_s26), 0  ;;  %1062 = sbr.rel (!%p1059_p12) target bundleno = 1083 (0x43b), region = 160 }
 0x43f   : >> { %1079 = vst [vmem:[%s1546_s20 + $0x30] sm:$0xff] %v1078_v16  ;;  %1081 = vst [vmem:[%s1546_s20 + $0x38] sm:$0xff] %v1080_v17  ;;  %v1084_v19 = vld [vmem:[%s1550_s19 + $0x48] sm:$0xff]  ;;  %v1086_v20 = vld [vmem:[%s1550_s19 + $0x50] sm:$0xff]  ;;  %s1283_s27 = sshll.u32 %s1901_s26, 7  ;;  %s1894_s22 = smov %s1901_s26 }
 0x440   : >> { %1083 = vst [vmem:[%s1546_s20 + $0x40] sm:$0xff] %v1082_v18  ;;  %v1088_v21 = vld [vmem:[%s1550_s19 + $0x58] sm:$0xff]  ;;  %1085 = vst [vmem:[%s1546_s20 + $0x48] sm:$0xff] %v1084_v19  ;;  %v1090_v22 = vld [vmem:[%s1550_s19 + $0x60] sm:$0xff] }
 0x441   : >> { %1087 = vst [vmem:[%s1546_s20 + $0x50] sm:$0xff] %v1086_v20  ;;  %1089 = vst [vmem:[%s1546_s20 + $0x58] sm:$0xff] %v1088_v21  ;;  %v1092_v23 = vld [vmem:[%s1550_s19 + $0x68] sm:$0xff]  ;;  %v1094_v24 = vld [vmem:[%s1550_s19 + $0x70] sm:$0xff] }
 0x442   : >> { %1091 = vst [vmem:[%s1546_s20 + $0x60] sm:$0xff] %v1090_v22  ;;  %1093 = vst [vmem:[%s1546_s20 + $0x68] sm:$0xff] %v1092_v23  ;;  %v1096_v25 = vld [vmem:[%s1550_s19 + $0x78] sm:$0xff]  ;;  %s1103_s19 = scalar_lea.vmem %s1745_s29, %s1283_s27 [#allocation2]  }
 0x443   : >> { %1095 = vst [vmem:[%s1546_s20 + $0x70] sm:$0xff] %v1094_v24  ;;  %1097 = vst [vmem:[%s1546_s20 + $0x78] sm:$0xff] %v1096_v25  ;;  %s1104_s20 = scalar_lea.vmem %s1786_s15, %s1283_s27  }
 0x445 PF: > { %s1861_s28 = sand.u32 15, %s1899_s12   ;;  %s1294_s17 = sshll.u32 %s1792_s25, 7 }
 0x446   : > { %s1109_s30 = scalar_lea.vmem %s1745_s29, %s1294_s17 [#allocation2]   ;;  %s1111_s13 = scalar_lea.vmem %s1786_s15, %s1294_s17  }
 0x447   : > { %p1288_p13 = scmp.le.s32.totalorder %s1861_s28, 0 }
 0x448   : > { %s1560_s14 = smov (!%p1288_p13), %s1111_s13   ;;  %s1564_s16 = smov (!%p1288_p13), %s1109_s30  }
 0x449   : > { %1205 = sbr.rel (%p1288_p13) target bundleno = 1114 (0x45a), region = 165  ;;  %s1568_s27 = smov (!%p1288_p13), 0  }
 0x44a   : > { %s1572_s26 = smov (!%p1288_p13), 0  }
 0x450 LB: >> { %v1121_v26 = vld [vmem:[%s1566_s16] sm:$0xff]  ;;  %s1123_s12 = sadd.s32 1, %s1570_s27  ;;  %s1115_s26 = sadd.s32 1, %s1574_s26   ;;  %s1574_s26 = sphi %s1572_s26, %s1115_s26   ;;  %s1570_s27 = sphi %s1568_s27, %s1569_s27   ;;  %s1566_s16 = sphi %s1564_s16, %s1128_s16   ;;  %s1562_s14 = sphi %s1560_s14, %s1129_s14  }
 0x451   : >> { %1122 = vst [vmem:[%s1562_s14] sm:$0xff] %v1121_v26  ;;  %p1124_p0 = scmp.ge.s32.totalorder %s1123_s12, %s1861_s28  ;;  %p1114_p1 = scmp.ge.s32.totalorder %s1115_s26, %s1861_s28 }
 0x453   : >> { %s1903_s12 = smov (%p1124_p0, %s1123_s12), 0  ;;  %1117 = sbr.rel (!%p1114_p1) target bundleno = 1104 (0x450), region = 171 }
 0x454   : >> { %s1289_s29 = sshll.u32 %s1903_s12, 3  ;;  %s1569_s27 = smov %s1903_s12  }
 0x455   : >> { %s1128_s16 = scalar_lea.vmem %s1109_s30, %s1289_s29 [#allocation2]   ;;  %s1129_s14 = scalar_lea.vmem %s1111_s13, %s1289_s29  }
 0x45a PF: > { %p18_p2 = scmp.ge.s32.totalorder %s1654_s21, 5   ;;  %s1895_s17 = smov %s1538_s18 }
 0x45b   : > { %s1896_s18 = smov %s1662_s24  ;;  %s1897_s19 = smov %s1654_s21 }
 0x45c   :  { %20 = sbr.rel (!%p18_p2) target bundleno = 2 (0x2), region = 182 }

</bundles_post_ra>
